<compile_context>
chip_gen: v7x
topology: tpu7x:2x2x1
jax: 0.10.0
libtpu: 0.0.40
codegen_flags: <defaults>
</compile_context>

<pallas_src>
import functools

import jax
import jax.numpy as jnp
from jax.experimental import pallas as pl
from jax.experimental.pallas import tpu as pltpu


def _round_up(x, m):
    return ((x + m - 1) // m) * m


def actor_critic_kernel(
    x_ref,                       # (input_size, TB)  x^T tile, matmul dtype
    w_aff_ref, b_aff_ref,        # (hidden, input_size), (hidden, 1)
    w_h1_ref, b_h1_ref,          # fused head layer 1^T: (hidden, hidden), (hidden, 1)
    w_h2_ref, b_h2_ref,          # fused block-diag layer 2^T: (OUT_SUB, hidden), (OUT_SUB, 1)
    out_ref,                     # (OUT_SUB, TB) f32 slab: rows [probs | value | zeros]
    *,
    num_actions,
):
    dot_dtype = w_aff_ref.dtype  # bf16 or f32 matmul operands; accumulate in f32

    # Shared trunk (transposed): enc0^T = relu(W_aff^T @ x^T + b_aff^T)
    enc0 = jnp.dot(w_aff_ref[...], x_ref[...], preferred_element_type=jnp.float32)
    enc0 = jnp.maximum(enc0 + b_aff_ref[...], 0.0)

    # Fused head layer 1: one matmul + one tanh covers both action and value
    # first layers (rows [0:half) -> action hidden, [half:hidden) -> value hidden).
    h1 = jnp.dot(w_h1_ref[...], enc0.astype(dot_dtype),
                 preferred_element_type=jnp.float32)
    h1 = jnp.tanh(h1 + b_h1_ref[...])

    # Fused head layer 2: block-diagonal.  Rows [0:num_actions) = action
    # logits, row num_actions = value, remaining rows = 0 (zero weights/bias).
    out2 = jnp.dot(w_h2_ref[...], h1.astype(dot_dtype),
                   preferred_element_type=jnp.float32)
    out2 = out2 + b_h2_ref[...]

    # Softmax over the logit rows (sublane reduction, XLU).  Non-logit rows
    # are masked with -1e30; exp underflows to exactly 0, so no second select
    # is needed before the sum, and no infs are ever generated.
    row = jax.lax.broadcasted_iota(jnp.int32, out2.shape, 0)
    is_logit = row < num_actions
    masked = jnp.where(is_logit, out2, jnp.float32(-1e30))
    m = jnp.max(masked, axis=0, keepdims=True)
    e = jnp.exp(masked - m)
    denom = jnp.sum(e, axis=0, keepdims=True)
    probs = e * pl.reciprocal(denom, approx=False)   # exact: probs sum to 1

    # Lane-dense slab: probs rows, raw out2 elsewhere (value row keeps the
    # critic output, padded rows are exactly zero).
    out_ref[...] = jnp.where(is_logit, probs, out2).astype(out_ref.dtype)


def actor_critic_forward(x, params, *, block_batch=1024, matmul_dtype=jnp.bfloat16):
    """x: (batch, input_size) float32.  Returns (action_prob, state_values)."""
    x = jnp.asarray(x, jnp.float32)
    batch, input_size = x.shape
    hidden = params["w_aff"].shape[1]
    half = hidden // 2
    num_actions = params["w_a2"].shape[1]
    out_sub = max(8, _round_up(num_actions + 1, 8))   # output rows (sublanes)

    # ---- fuse + transpose parameters (plain JAX, once per call) ------------
    w_aff_t = params["w_aff"].T                        # (hidden, input_size)
    b_aff_t = params["b_aff"].T                        # (hidden, 1)
    # layer 1: concat along output -> one (hidden, hidden) matmul
    w_h1_t = jnp.concatenate([params["w_a1"], params["w_v1"]], axis=1).T
    b_h1_t = jnp.concatenate([params["b_a1"], params["b_v1"]], axis=1).T
    # layer 2: block-diagonal, zero-padded to out_sub rows
    w_h2_t = jnp.zeros((out_sub, hidden), jnp.float32)
    w_h2_t = w_h2_t.at[:num_actions, :half].set(params["w_a2"].T)
    w_h2_t = w_h2_t.at[num_actions:num_actions + 1, half:].set(params["w_v2"].T)
    b_h2_t = jnp.zeros((out_sub, 1), jnp.float32)
    b_h2_t = b_h2_t.at[:num_actions, :].set(params["b_a2"].T)
    b_h2_t = b_h2_t.at[num_actions:num_actions + 1, :].set(params["b_v2"].T)

    # Matmul operands (x + weight matrices) cast to matmul_dtype (bf16 by
    # default, the native MXU operand dtype); biases / elementwise stay f32.
    w_aff_t = w_aff_t.astype(matmul_dtype)
    w_h1_t = w_h1_t.astype(matmul_dtype)
    w_h2_t = w_h2_t.astype(matmul_dtype)

    # ---- batch tiling: batch lives on the lane axis -------------------------
    padded_batch = _round_up(batch, 128)
    n_steps = max(1, pl.cdiv(padded_batch, _round_up(block_batch, 128)))
    # Keep >= 2 grid steps when the batch allows so v7x's second TensorCore
    # gets work via the "parallel" batch axis (one extra ~0.35us step on
    # single-TC v5e/v6e is negligible).
    if n_steps == 1 and padded_batch >= 256:
        n_steps = 2
    tb = _round_up(pl.cdiv(padded_batch, n_steps), 128)
    padded_batch = tb * n_steps
    grid = (n_steps,)

    x_t = jnp.pad(x.astype(matmul_dtype), ((0, padded_batch - batch), (0, 0))).T

    # ---- VMEM budget: actual footprint + headroom (not a flat 32 MiB) -------
    # Double-buffered streams (x^T tile + output slab) + lane-padded resident
    # weights; even at multi-K-row tiles this is ~1 MiB, far under every
    # generation's scoped default (v5e 16 MiB, v6e/v7x 32 MiB).
    itemsize = jnp.dtype(matmul_dtype).itemsize
    stream_bytes = 2 * (input_size * tb * itemsize) + 2 * (out_sub * tb * 4)
    resident_bytes = 128 * (2 * hidden * itemsize + out_sub * itemsize
                            + 2 * hidden * 4 + out_sub * 4)
    vmem_limit = int(max(8 << 20, 2 * (stream_bytes + resident_bytes) + (1 << 20)))

    def resident(shape):
        # weights/biases: full-shape block, same block every grid step
        return pl.BlockSpec(shape, lambda i: (0, 0))

    kernel = functools.partial(actor_critic_kernel, num_actions=num_actions)

    slab = pl.pallas_call(
        kernel,
        out_shape=jax.ShapeDtypeStruct((out_sub, padded_batch), jnp.float32),
        grid=grid,
        in_specs=[
            pl.BlockSpec((input_size, tb), lambda i: (0, i)),   # x^T streams
            resident((hidden, input_size)),
            resident((hidden, 1)),
            resident((hidden, hidden)),
            resident((hidden, 1)),
            resident((out_sub, hidden)),
            resident((out_sub, 1)),
        ],
        out_specs=pl.BlockSpec((out_sub, tb), lambda i: (0, i)),
        compiler_params=pltpu.CompilerParams(
            dimension_semantics=("parallel",),   # batch axis -> 2 TCs on v7x
            vmem_limit_bytes=vmem_limit,
        ),
    )(x_t, w_aff_t, b_aff_t, w_h1_t, b_h1_t, w_h2_t, b_h2_t)

    probs = slab[:num_actions, :batch].T
    values = slab[num_actions:num_actions + 1, :batch].T
    return probs, values


def init_params(key, input_size, hidden, num_actions):
    """Deterministic synthetic parameters (PyTorch Linear-style uniform init)."""
    def linear(key, fan_in, fan_out):
        k_w, k_b = jax.random.split(key)
        bound = 1.0 / jnp.sqrt(jnp.float32(fan_in))
        w = jax.random.uniform(k_w, (fan_in, fan_out), jnp.float32, -bound, bound)
        b = jax.random.uniform(k_b, (1, fan_out), jnp.float32, -bound, bound)
        return w, b

    keys = jax.random.split(key, 5)
    half = hidden // 2
    w_aff, b_aff = linear(keys[0], input_size, hidden)
    w_a1, b_a1 = linear(keys[1], hidden, half)
    w_a2, b_a2 = linear(keys[2], half, num_actions)
    w_v1, b_v1 = linear(keys[3], hidden, half)
    w_v2, b_v2 = linear(keys[4], half, 1)
    return dict(
        w_aff=w_aff, b_aff=b_aff,
        w_a1=w_a1, b_a1=b_a1,
        w_a2=w_a2, b_a2=b_a2,
        w_v1=w_v1, b_v1=b_v1,
        w_v2=w_v2, b_v2=b_v2,
    )


def reference_forward(x, p):
    """Plain-JAX reference matching the PyTorch forward, for verification."""
    enc0 = jax.nn.relu(x @ p["w_aff"] + p["b_aff"])
    logits = jnp.tanh(enc0 @ p["w_a1"] + p["b_a1"]) @ p["w_a2"] + p["b_a2"]
    probs = jax.nn.softmax(logits, axis=-1)
    values = jnp.tanh(enc0 @ p["w_v1"] + p["b_v1"]) @ p["w_v2"] + p["b_v2"]
    return probs, values


if __name__ == "__main__":
    # Shapes consistent with the module's forward; batch large enough to
    # exercise the pipelined, 2-step parallel batch grid.
    batch = 256
    input_size = 16
    hidden_layer_size = 32
    num_actions = 4

    key = jax.random.PRNGKey(0)
    k_x, k_p = jax.random.split(key)
    x = jax.random.normal(k_x, (batch, input_size), jnp.float32)
    params = init_params(k_p, input_size, hidden_layer_size, num_actions)

    ref_probs, ref_values = reference_forward(x, params)

    # Default path: bf16 matmul operands, grid of 2 x 128-lane batch tiles.
    probs, values = actor_critic_forward(x, params)
    jax.block_until_ready((probs, values))
    assert probs.shape == (batch, num_actions)
    assert values.shape == (batch, 1)
    assert jnp.allclose(probs, ref_probs, atol=5e-2, rtol=5e-2)
    assert jnp.allclose(values, ref_values, atol=5e-2, rtol=5e-2)
    # exact (non-approx) softmax normalization
    assert jnp.allclose(jnp.sum(probs, axis=-1), 1.0, atol=1e-4)

    # f32 matmul-operand path with a non-multiple batch (exercises padding
    # and the single-tile grid).
    probs32, values32 = actor_critic_forward(
        x[:50], params, matmul_dtype=jnp.float32, block_batch=256)
    jax.block_until_ready((probs32, values32))
    assert probs32.shape == (50, num_actions)
    assert values32.shape == (50, 1)
    assert jnp.allclose(probs32, ref_probs[:50], atol=1e-4, rtol=1e-4)
    assert jnp.allclose(values32, ref_values[:50], atol=1e-4, rtol=1e-4)
    assert jnp.allclose(jnp.sum(probs32, axis=-1), 1.0, atol=1e-4)

    print("KERNEL_OK")
</pallas_src>

<mosaic_0001>
module attributes {stable_mosaic.version = 11 : i64} {
  func.func @actor_critic_kernel(%arg0: i32, %arg1: memref<16x128xbf16, #tpu.memory_space<vmem>>, %arg2: memref<32x16xbf16, #tpu.memory_space<vmem>>, %arg3: memref<32x1xf32, #tpu.memory_space<vmem>>, %arg4: memref<32x32xbf16, #tpu.memory_space<vmem>>, %arg5: memref<32x1xf32, #tpu.memory_space<vmem>>, %arg6: memref<8x32xbf16, #tpu.memory_space<vmem>>, %arg7: memref<8x1xf32, #tpu.memory_space<vmem>>, %arg8: memref<8x128xf32, #tpu.memory_space<vmem>>) attributes {dimension_semantics = [#tpu.dimension_semantics<parallel>], iteration_bounds = array<i64: 2>, scalar_prefetch = 0 : i64, scratch_operands = 0 : i64, tpu.core_type = #tpu.core_type<tc>, window_params = [{transform_indices = @transform_0, window_bounds = array<i64: 16, 128>}, {pipeline_mode = #tpu.pipeline_mode<synchronous>, transform_indices = @transform_1, window_bounds = array<i64: 32, 16>}, {pipeline_mode = #tpu.pipeline_mode<synchronous>, transform_indices = @transform_2, window_bounds = array<i64: 32, 1>}, {pipeline_mode = #tpu.pipeline_mode<synchronous>, transform_indices = @transform_3, window_bounds = array<i64: 32, 32>}, {pipeline_mode = #tpu.pipeline_mode<synchronous>, transform_indices = @transform_4, window_bounds = array<i64: 32, 1>}, {pipeline_mode = #tpu.pipeline_mode<synchronous>, transform_indices = @transform_5, window_bounds = array<i64: 8, 32>}, {pipeline_mode = #tpu.pipeline_mode<synchronous>, transform_indices = @transform_6, window_bounds = array<i64: 8, 1>}, {transform_indices = @transform_7, window_bounds = array<i64: 8, 128>}]} {
    %c0 = arith.constant 0 : index
    %c0_0 = arith.constant 0 : index
    %0 = vector.load %arg2[%c0, %c0_0] : memref<32x16xbf16, #tpu.memory_space<vmem>>, vector<32x16xbf16>
    %c0_1 = arith.constant 0 : index
    %c0_2 = arith.constant 0 : index
    %1 = vector.load %arg1[%c0_1, %c0_2] : memref<16x128xbf16, #tpu.memory_space<vmem>>, vector<16x128xbf16>
    %cst = arith.constant dense<0.000000e+00> : vector<32x128xf32>
    %2 = tpu.matmul %0, %1, %cst {dimension_numbers = #tpu.dot_dimension_numbers<[1], [0], [0], [1], [0, 0, 1, 1], [], []>} : vector<32x16xbf16>, vector<16x128xbf16>, vector<32x128xf32> -> vector<32x128xf32>
    %c0_3 = arith.constant 0 : index
    %c0_4 = arith.constant 0 : index
    %3 = vector.load %arg3[%c0_3, %c0_4] : memref<32x1xf32, #tpu.memory_space<vmem>>, vector<32x1xf32>
    %4 = vector.broadcast %3 : vector<32x1xf32> to vector<32x128xf32>
    %5 = arith.addf %2, %4 : vector<32x128xf32>
    %cst_5 = arith.constant 0.000000e+00 : f32
    %6 = vector.broadcast %cst_5 : f32 to vector<32x128xf32>
    %7 = arith.maximumf %5, %6 : vector<32x128xf32>
    %c0_6 = arith.constant 0 : index
    %c0_7 = arith.constant 0 : index
    %8 = vector.load %arg4[%c0_6, %c0_7] : memref<32x32xbf16, #tpu.memory_space<vmem>>, vector<32x32xbf16>
    %9 = arith.truncf %7 : vector<32x128xf32> to vector<32x128xbf16>
    %cst_8 = arith.constant dense<0.000000e+00> : vector<32x128xf32>
    %10 = tpu.matmul %8, %9, %cst_8 {dimension_numbers = #tpu.dot_dimension_numbers<[1], [0], [0], [1], [0, 0, 1, 1], [], []>} : vector<32x32xbf16>, vector<32x128xbf16>, vector<32x128xf32> -> vector<32x128xf32>
    %c0_9 = arith.constant 0 : index
    %c0_10 = arith.constant 0 : index
    %11 = vector.load %arg5[%c0_9, %c0_10] : memref<32x1xf32, #tpu.memory_space<vmem>>, vector<32x1xf32>
    %12 = vector.broadcast %11 : vector<32x1xf32> to vector<32x128xf32>
    %13 = arith.addf %10, %12 : vector<32x128xf32>
    %14 = math.tanh %13 : vector<32x128xf32>
    %c0_11 = arith.constant 0 : index
    %c0_12 = arith.constant 0 : index
    %15 = vector.load %arg6[%c0_11, %c0_12] : memref<8x32xbf16, #tpu.memory_space<vmem>>, vector<8x32xbf16>
    %16 = arith.truncf %14 : vector<32x128xf32> to vector<32x128xbf16>
    %cst_13 = arith.constant dense<0.000000e+00> : vector<8x128xf32>
    %17 = tpu.matmul %15, %16, %cst_13 {dimension_numbers = #tpu.dot_dimension_numbers<[1], [0], [0], [1], [0, 0, 1, 1], [], []>} : vector<8x32xbf16>, vector<32x128xbf16>, vector<8x128xf32> -> vector<8x128xf32>
    %c0_14 = arith.constant 0 : index
    %c0_15 = arith.constant 0 : index
    %18 = vector.load %arg7[%c0_14, %c0_15] : memref<8x1xf32, #tpu.memory_space<vmem>>, vector<8x1xf32>
    %19 = vector.broadcast %18 : vector<8x1xf32> to vector<8x128xf32>
    %20 = arith.addf %17, %19 : vector<8x128xf32>
    %21 = tpu.iota {dimensions = array<i32: 0>} : vector<8x128xi32>
    %c4_i32 = arith.constant 4 : i32
    %22 = vector.broadcast %c4_i32 : i32 to vector<8x128xi32>
    %23 = arith.cmpi slt, %21, %22 : vector<8x128xi32>
    %cst_16 = arith.constant -1.000000e+30 : f32
    %24 = vector.broadcast %cst_16 : f32 to vector<8x128xf32>
    %25 = arith.select %23, %20, %24 : vector<8x128xi1>, vector<8x128xf32>
    %cst_17 = arith.constant dense<0xFF800000> : vector<128xf32>
    %26 = vector.multi_reduction <maximumf>, %25, %cst_17 [0] : vector<8x128xf32> to vector<128xf32>
    %27 = vector.shape_cast %26 : vector<128xf32> to vector<1x128xf32>
    %28 = vector.broadcast %27 : vector<1x128xf32> to vector<8x128xf32>
    %29 = arith.subf %25, %28 : vector<8x128xf32>
    %30 = math.exp %29 : vector<8x128xf32>
    %cst_18 = arith.constant dense<0.000000e+00> : vector<128xf32>
    %31 = vector.multi_reduction <add>, %30, %cst_18 [0] : vector<8x128xf32> to vector<128xf32>
    %32 = vector.shape_cast %31 : vector<128xf32> to vector<1x128xf32>
    %33 = tpu.reciprocal %32 : vector<1x128xf32> -> vector<1x128xf32>
    %34 = vector.broadcast %33 : vector<1x128xf32> to vector<8x128xf32>
    %35 = arith.mulf %30, %34 : vector<8x128xf32>
    %36 = arith.select %23, %35, %20 : vector<8x128xi1>, vector<8x128xf32>
    %c0_19 = arith.constant 0 : index
    %c0_20 = arith.constant 0 : index
    %37 = vector.load %arg8[%c0_19, %c0_20] : memref<8x128xf32, #tpu.memory_space<vmem>>, vector<8x128xf32>
    tpu.vector_store %arg8[%c0_19, %c0_20], %36 {strides = array<i32>} : memref<8x128xf32, #tpu.memory_space<vmem>>, vector<8x128xf32>,
    return
  }
  func.func @transform_0(%arg0: i32) -> (i32, i32) {
    %c0_i32 = arith.constant 0 : i32
    %c0_i32_0 = arith.constant 0 : i32
    return %c0_i32, %arg0 : i32, i32
  }
  func.func @transform_1(%arg0: i32) -> (i32, i32) {
    %c0_i32 = arith.constant 0 : i32
    %c0_i32_0 = arith.constant 0 : i32
    %c0_i32_1 = arith.constant 0 : i32
    return %c0_i32, %c0_i32_0 : i32, i32
  }
  func.func @transform_2(%arg0: i32) -> (i32, i32) {
    %c0_i32 = arith.constant 0 : i32
    %c0_i32_0 = arith.constant 0 : i32
    %c0_i32_1 = arith.constant 0 : i32
    return %c0_i32, %c0_i32_0 : i32, i32
  }
  func.func @transform_3(%arg0: i32) -> (i32, i32) {
    %c0_i32 = arith.constant 0 : i32
    %c0_i32_0 = arith.constant 0 : i32
    %c0_i32_1 = arith.constant 0 : i32
    return %c0_i32, %c0_i32_0 : i32, i32
  }
  func.func @transform_4(%arg0: i32) -> (i32, i32) {
    %c0_i32 = arith.constant 0 : i32
    %c0_i32_0 = arith.constant 0 : i32
    %c0_i32_1 = arith.constant 0 : i32
    return %c0_i32, %c0_i32_0 : i32, i32
  }
  func.func @transform_5(%arg0: i32) -> (i32, i32) {
    %c0_i32 = arith.constant 0 : i32
    %c0_i32_0 = arith.constant 0 : i32
    %c0_i32_1 = arith.constant 0 : i32
    return %c0_i32, %c0_i32_0 : i32, i32
  }
  func.func @transform_6(%arg0: i32) -> (i32, i32) {
    %c0_i32 = arith.constant 0 : i32
    %c0_i32_0 = arith.constant 0 : i32
    %c0_i32_1 = arith.constant 0 : i32
    return %c0_i32, %c0_i32_0 : i32, i32
  }
  func.func @transform_7(%arg0: i32) -> (i32, i32) {
    %c0_i32 = arith.constant 0 : i32
    %c0_i32_0 = arith.constant 0 : i32
    return %c0_i32, %arg0 : i32, i32
  }
}

</mosaic_0001>

<bundles_post_ra>
// kernel: tpu_custom_call.1
= control target key start
LH: loop header
LB: loop body
LE: loop exit
PB: predicated region body
PF: predicated region fallthrough
CT: control target
= control target key end

     0   :  { %12 = vsyncpa [#allocation4], 0  ;;  %s1068_s0 = inlined_call_operand.vmem [shape: bf16[16,256], index: 0, kind: input, shape index: {}]   ;;  %s1069_s1 = inlined_call_operand.vmem [shape: bf16[32,16], index: 1, kind: input, shape index: {}]   ;;  %s1070_s2 = inlined_call_operand.vmem [shape: f32[32,1], index: 2, kind: input, shape index: {}]   ;;  %s1071_s3 = inlined_call_operand.vmem [shape: bf16[32,32], index: 3, kind: input, shape index: {}]   ;;  %s1072_s4 = inlined_call_operand.vmem [shape: f32[32,1], index: 4, kind: input, shape index: {}]   ;;  %s1073_s5 = inlined_call_operand.vmem [shape: bf16[8,32], index: 5, kind: input, shape index: {}]   ;;  %s1074_s6 = inlined_call_operand.vmem [shape: f32[8,1], index: 6, kind: input, shape index: {}]   ;;  %s1075_s7 = inlined_call_operand.hbm [shape: f32[8,256], index: 7, kind: output, shape index: {}]  }
   0x1   :  { %14 = vsyncpa [#allocation4 + $0x1], 0  ;;  %s906_s24 = smov 0   ;;  %s908_s25 = smov 0  }
   0x2   :  { %s910_s26 = smov 0   ;;  %s912_s27 = smov 0  }
   0x3 LB: > { %s682_s28 = sadd.s32 4294967295, %s860_s27   ;;  %s683_s29 = sadd.s32 4294967294, %s860_s27   ;;  %s860_s27 = sphi %s912_s27, %s1081_s27   ;;  %s856_s26 = sphi %s910_s26, %s1080_s26   ;;  %s852_s25 = sphi %s908_s25, %s1079_s25   ;;  %s848_s24 = sphi %s906_s24, %s1078_s24  }
   0x4   : > { %s929_s30 = sadd.s32 1, %s860_s27   ;;  %s27_s8 = sadd.s32 1, %s856_s26 }
   0x5   : > { %s24_s9 = ssub.s32 %s860_s27, %s929_s30  ;;  %p34_p0 = scmp.ne.s32.totalorder %s856_s26, %s852_s25 }
   0x6   : > { %p25_p1 = scmp.eq.s32.totalorder %s24_s9, 0  ;;  %p35_p2 = scmp.eq.s32.totalorder %s860_s27, 0 }
   0x7   : > { %p190_p3 = scmp.eq.s32.totalorder %s682_s28, 1  ;;  %p195_p4 = scmp.ne.s32.totalorder %s852_s25, %s848_s24 }
   0x8   : > { %s942_s10 = scalar_select %p25_p1, %s856_s26, %s27_s8  }
   0x9   : > { %p36_p5 = por %p35_p2, %p34_p0  ;;  %p944_p6 = por %p190_p3, %p34_p0 }
   0xa   : > { %p196_p7 = scmp.eq.s32.totalorder %s683_s29, 1  ;;  %p685_p9 = scmp.ge.s32.totalorder %s860_s27, 2 }
   0xc   : > { %p948_p8 = por %p196_p7, %p195_p4  ;;  %230 = sbr.rel (%p685_p9) target bundleno = 26 (0x1a), region = 40 }
  0x13   : > { %233 = sbr.rel (!%p36_p5) target bundleno = 26 (0x1a), region = 44  ;;  %s235_s13 = sand.u32 (%p36_p5), 1, %s856_s26  }
  0x14   : > { %s687_s14 = sshll.u32 (%p36_p5), %s860_s27, 2  ;;  %s686_s15 = sshll.u32 (%p36_p5), %s235_s13, 3 }
  0x15   : > { %s239_s18 = scalar_lea.vmem (%p36_p5), %s1068_s0, %s687_s14  ;;  %s237_s19 = scalar_lea.vmem (%p36_p5), [#allocation2], %s686_s15 }
  0x16   : > { %v255_v0 = vld [vmem:[%s239_s18] sm:$0xf] (%p36_p5)  ;;  %v257_v1 = vld [vmem:[%s239_s18 + $0x8] sm:$0xf] (%p36_p5) }
  0x17   : > { %256 = vst [vmem:[%s237_s19] sm:$0xf] (%p36_p5), %v255_v0  ;;  %258 = vst [vmem:[%s237_s19 + $0x4] sm:$0xf] (%p36_p5), %v257_v1 }
  0x1a PF: > { %p688_p10 = scmp.ge.s32.totalorder %s860_s27, 1  ;;  %p284_p11 = scmp.lt.s32.totalorder %s860_s27, 3 }
  0x1c   : > { %p285_p12 = pnand %p688_p10, %p284_p11 }
  0x1d   : > { %s291_s20 = sand.u32 (!%p285_p12), 1, %s852_s25   ;;  %v782_v2 = vld [vmem:[%s1069_s1] sm:$0xff] (!%p285_p12)   ;;  %vm369_vm0 = vcmask (!%p285_p12), 130048   ;;  %v862_v5 = vmov (!%p285_p12), 0   ;;  %v331_v6 = vld [vmem:[%s1070_s2 + $0x10] sm:$0xff] (!%p285_p12)  ;;  %v783_v7 = vld [vmem:[%s1069_s1 + $0x8] sm:$0xff] (!%p285_p12)   ;;  %v581_v55 = vlaneseq (!%p285_p12) }
  0x1e   : > { %288 = sbr.rel (%p285_p12) target bundleno = 785 (0x311), region = 85  ;;  %s968_s23 = sshll.u32 (!%p285_p12), %s291_s20, 3  ;;  %717 = vmatprep.mubr.msk.bf16.mxu0 (!%p285_p12), %vm369_vm0, %v782_v2  ;;  %v329_v3 = vld [vmem:[%s1070_s2] sm:$0xff] (!%p285_p12)  ;;  %779 = vset.pattern.permute.xlu0 (!%p285_p12), %v862_v5  ;;  %v330_v8 = vld [vmem:[%s1070_s2 + $0x8] sm:$0xff] (!%p285_p12)  ;;  %v332_v9 = vld [vmem:[%s1070_s2 + $0x18] sm:$0xff] (!%p285_p12)  ;;  %vm469_vm1 = vcmask (!%p285_p12), 261120  }
  0x1f   : > { %s293_s9 = scalar_lea.vmem (!%p285_p12), [#allocation2], %s968_s23  ;;  %780 = vset.pattern.permute.xlu1 (!%p285_p12), %v862_v5  ;;  %335 = vperm.xlu0 (!%p285_p12), %779, %v329_v3   ;;  %v435_v10 = vld [vmem:[%s1072_s4] sm:$0xff] (!%p285_p12)  ;;  %v436_v11 = vld [vmem:[%s1072_s4 + $0x8] sm:$0xff] (!%p285_p12)  ;;  %v437_v12 = vld [vmem:[%s1072_s4 + $0x10] sm:$0xff] (!%p285_p12)  ;;  %v863_v35 = vmov (!%p285_p12), 0.0   ;;  %vm864_vm2 = vmmov (!%p285_p12), 0  }
  0x20   : > { %v781_v4 = vld [vmem:[%s293_s9] sm:$0xff] (!%p285_p12)   ;;  %345 = vperm.xlu1 (!%p285_p12), %780, %v331_v6   ;;  %v438_v13 = vld [vmem:[%s1072_s4 + $0x18] sm:$0xff] (!%p285_p12)  ;;  %v582_v56 = vshrl.u32 (!%p285_p12), %v581_v55, 7  ;;  %s702_s13 = sshll.u32 (!%p285_p12), %s682_s28, 7  ;;  %s321_s14 = scalar_lea.vmem (!%p285_p12), [#allocation3], %s968_s23 }
  0x21   : > { %715 = vmatprep.subr.bf16.mxu0 (!%p285_p12), %v781_v4  ;;  %v532_v14 = vld [vmem:[%s1074_s6] sm:$0xff] (!%p285_p12)  ;;  %v785_v34 = vld [vmem:[%s1071_s3 + $0x8] sm:$0xff] (!%p285_p12)   ;;  %s618_s15 = sshll.u32 (!%p285_p12), %s321_s14, 4  ;;  %s1022_s18 = scalar_lea.hbm (!%p285_p12), %s1075_s7, %s702_s13  ;;  %s1024_s15 = int_to_ptr.vmem [resolvable:$true] %s618_s15 }
  0x22   : > { %716 = vmatpush3.bf16.msra.mxu0 (!%p285_p12), %v781_v4  ;;  %v784_v15 = vld [vmem:[%s1071_s3] sm:$0xff] (!%p285_p12)   ;;  %vm583_vm3 = vcmp.lt.s32.totalorder (!%p285_p12), %v582_v56, 4  ;;  %s605_s19 = scalar_lea.sflag (!%p285_p12), [#allocation4], %s291_s20  ;;  %s798_s28 = scalar_lea.vmem (!%p285_p12), %s1024_s15, 128 }
  0x23   : > { %340 = vperm.xlu0 (!%p285_p12), %779, %v330_v8   ;;  %725 = vmatprep.mubr.msk.bf16.mxu1 (!%p285_p12), %vm469_vm1, %v784_v15  ;;  %v529_v54 = vld [vmem:[%s1073_s5] sm:$0xf] (!%p285_p12)  ;;  %p799_p13 = scmp.ne.s32.totalorder (!%p285_p12), %s1024_s15, %s798_s28  ;;  %s865_s23 = smov (!%p285_p12), [#allocation3]  }
  0x24   : > { %350 = vperm.xlu1 (!%p285_p12), %780, %v332_v9   ;;  %729 = vmatprep.subr.bf16.mxu0 (!%p285_p12), %v863_v35  ;;  %s802_s21 = sshll.u32 (!%p285_p12), %s865_s23, 4  ;;  %s803_s21 = int_to_ptr.vmem [resolvable:$false] %s802_s21 }
  0x25   : > { %718 = vmatmul.mubr.msk.bf16.vlgmr.msra.gmra.mrb[0].mxu0 %vm369_vm0, %v783_v7  ;;  %p800_p0 = pnand %p799_p13, %p944_p6  ;;  %s804_s22 = scalar_lea.vmem %s803_s21, 256 }
  0x26   : > { %733 = vmatprep.mubr.msk.bf16.mxu0 %vm864_vm2, %v863_v35  ;;  %p805_p2 = scmp.lt.s32.totalorder %s1024_s15, %s803_s21  ;;  %p806_p3 = scmp.lt.s32.totalorder %s804_s22, %s798_s28 }
  0x27   : > { %441 = vperm.xlu0 %779, %v435_v10   ;;  %p801_p1 = pneg %p800_p0 }
  0x28   : > { %446 = vperm.xlu1 %780, %v436_v11   ;;  %p807_p4 = por %p806_p3, %p805_p2 }
  0x2a   : > { %p808_p5 = pnand %p807_p4, %p801_p1 }
  0x2b   : > { %451 = vperm.xlu0 %779, %v437_v12  }
  0x2c   : > { %456 = vperm.xlu1 %780, %v438_v13  }
  0x2f   : > { %535 = vperm.xlu0 %779, %v532_v14  }
  0x9e   : > { %v336_v17 = vpop.permute.xlu0 %335 }
  0x9f   : > { %v346_v16 = vpop.permute.xlu1 %345 }
  0xa2   : > { %v341_v24 = vpop.permute.xlu0 %340 }
  0xa3   : > { %v351_v21 = vpop.permute.xlu1 %350 }
  0xa6   : > { %v442_v36 = vpop.permute.xlu0 %441 }
  0xa7   : > { %v447_v37 = vpop.permute.xlu1 %446 }
  0xaa   : > { %v452_v38 = vpop.permute.xlu0 %451 }
  0xab   : > { %v457_v42 = vpop.permute.xlu1 %456 }
  0xae   : > { %v536_v57 = vpop.permute.xlu0 %535 }
  0xf8   : > { %v719_v18 = vpop.f32.mrb[0].mxu0 }
  0xf9   : > { %v419_v19 = vadd.f32 %v719_v18, %v346_v16  ;;  %v410_v20 = vpop.f32.mrb[1].mxu0 }
  0xfa   : > { %v411_v22 = vadd.f32 %v410_v20, %v336_v17  ;;  %v720_v23 = vpop.f32.mrb[2].mxu0 }
  0xfb   : > { %v422_v25 = vadd.f32 %v720_v23, %v351_v21  ;;  %v413_v26 = vpop.f32.mrb[3].mxu0  ;;  %v427_v28 = vmax.f32 %v419_v19, 0.0 }
  0xfc   : > { %v414_v27 = vadd.f32 %v413_v26, %v341_v24  ;;  %v425_v30 = vmax.f32 %v411_v22, 0.0 }
  0xfd   : > { %v428_v29 = vmax.f32 %v422_v25, 0.0 }
  0xfe   : > { %v426_v31 = vmax.f32 %v414_v27, 0.0 }
  0xff   : > { %v434_v32 = vpack.c.bf16 %v428_v29, %v427_v28 }
 0x100   : > { %v433_v33 = vpack.c.bf16 %v426_v31, %v425_v30 }
 0x102   : > { %721 = vmatprep.subr.bf16.mxu1 %v433_v33 }
 0x103   : > { %722 = vmatpush3.bf16.msra.mxu1 %v433_v33 }
 0x104   : > { %723 = vmatprep.subr.bf16.mxu1 %v434_v32 }
 0x107   : > { %724 = vmatpush3.bf16.msra.mxu1 %v434_v32 }
 0x10a   : > { %726 = vmatmul.mubr.msk.bf16.vlgmr.msra.gmra.mrb[0].mxu1 %vm469_vm1, %v785_v34 }
 0x1dd   : > { %v727_v39 = vpop.f32.mrb[0].mxu1 }
 0x1de   : > { %v519_v40 = vadd.f32 %v727_v39, %v452_v38  ;;  %v510_v41 = vpop.f32.mrb[1].mxu1 }
 0x1df   : > { %v511_v43 = vadd.f32 %v510_v41, %v442_v36  ;;  %v728_v44 = vpop.f32.mrb[2].mxu1 }
 0x1e0   : > { %786 = vtanh.f32 %v519_v40  ;;  %v522_v45 = vadd.f32 %v728_v44, %v457_v42  ;;  %v513_v46 = vpop.f32.mrb[3].mxu1 }
 0x1e1   : > { %788 = vtanh.f32 %v511_v43  ;;  %v514_v47 = vadd.f32 %v513_v46, %v447_v37 }
 0x1e2   : > { %790 = vtanh.f32 %v522_v45 }
 0x1e3   : > { %792 = vtanh.f32 %v514_v47 }
 0x1ea   : > { %v787_v48 = vpop.eup %786 }
 0x1eb   : > { %v789_v49 = vpop.eup %788 }
 0x1ec   : > { %v791_v50 = vpop.eup %790 }
 0x1ed   : > { %v793_v51 = vpop.eup %792  ;;  %v531_v52 = vpack.c.bf16 %v791_v50, %v787_v48 }
 0x1ee   : > { %v530_v53 = vpack.c.bf16 %v793_v51, %v789_v49 }
 0x1f0   : > { %730 = vmatpush3.bf16.msra.mxu0 %v530_v53 }
 0x1f1   : > { %731 = vmatprep.subr.bf16.mxu0 %v863_v35 }
 0x1f4   : > { %732 = vmatpush3.bf16.msra.mxu0 %v531_v52 }
 0x1f7   : > { %734 = vmatmul.mubr.msk.bf16.vlgmr.msra.gmra.mrb[4].mxu0 %vm469_vm1, %v529_v54 }
 0x2ca   : > { %v575_v58 = vpop.f32.mrb[4].mxu0 }
 0x2cb   : > { %v576_v59 = vadd.f32 %v575_v58, %v536_v57  ;;  %v735_v60 = vpop.f32.mrb[5].mxu0 }
 0x2cc   : > { %v578_v61 = vpop.f32.mrb[6].mxu0 }
 0x2cd   : > { %v584_v62 = vsel %vm583_vm3, %v576_v59, -1e+30  ;;  %v736_v63 = vpop.f32.mrb[7].mxu0 }
 0x2ce   : > { %v585_v0 = vrot.slane %v584_v62, 4 }
 0x2d0   : > { %v586_v1 = vmax.f32 %v584_v62, %v585_v0 }
 0x2d2   : > { %v587_v2 = vrot.slane %v586_v1, 2 }
 0x2d4   : > { %v588_v3 = vmax.f32 %v586_v1, %v587_v2 }
 0x2d6   : > { %v589_v4 = vrot.slane %v588_v3, 1 }
 0x2d8   : > { %v590_v5 = vmax.f32 %v588_v3, %v589_v4 }
 0x2da   : > { %v591_v6 = vsub.f32 %v584_v62, %v590_v5 }
 0x2dc   : > { %v592_v7 = vmul.f32 1.442695, %v591_v6 }
 0x2de   : > { %794 = vpow2.f32 %v592_v7 }
 0x2e8   : > { %v795_v8 = vpop.eup %794 }
 0x2e9   : > { %v594_v9 = vrot.slane %v795_v8, 4 }
 0x2eb   : > { %v595_v10 = vadd.f32 %v795_v8, %v594_v9 }
 0x2ed   : > { %v596_v11 = vrot.slane %v595_v10, 2 }
 0x2ef   : > { %v597_v12 = vadd.f32 %v596_v11, %v595_v10 }
 0x2f1   : > { %v598_v13 = vrot.slane %v597_v12, 1 }
 0x2f3   : > { %v599_v14 = vadd.f32 %v598_v13, %v597_v12 }
 0x2f5   : > { %796 = vrcp.f32 %v599_v14 }
 0x2ff   : > { %v797_v15 = vpop.eup %796 }
 0x300   : > { %v601_v16 = vmul.f32 %v797_v15, %v795_v8 }
 0x302   : > { %v602_v17 = vsel %vm583_vm3, %v601_v16, %v576_v59 }
 0x303   : > { %603 = vst [vmem:[%s321_s14] sm:$0xff] %v602_v17 }
 0x304   : > { %811 = shalt.err (!%p808_p5)
}
 0x305   : > { %s812_s20 = scalar_lea.hbm %s1022_s18, 128  ;;  %s816_s9 = scalar_lea.hbm %s1075_s7, 256 }
 0x306   : > { %p813_p7 = scmp.ne.s32.totalorder %s1022_s18, %s812_s20  ;;  %p817_p12 = scmp.lt.u32.totalorder %s1022_s18, %s1075_s7 }
 0x307   : > { %p818_p13 = scmp.lt.u32.totalorder %s816_s9, %s812_s20  ;;  %p820_p1 = scmp.lt.u32.totalorder %s812_s20, %s1022_s18 }
 0x308   : > { %p814_p10 = pnand %p813_p7, %p944_p6 }
 0x309   : > { %p819_p0 = por %p818_p13, %p817_p12 }
 0x30a   : > { %p815_p11 = pneg %p814_p10 }
 0x30b   : > { %p821_p2 = por %p820_p1, %p819_p0 }
 0x30d   : > { %p822_p3 = pnand %p821_p2, %p815_p11 }
 0x30f   : > { %825 = shalt.err (!%p822_p3)
}
 0x310   : > { %737 = dma.vmem_to_hbm [thread:$0]  (%p944_p6), %s1024_s15, 128, %s1022_s18, %s605_s19  }
 0x311 PF: > { %s630_s16 = sand.u32 1, %s848_s24   ;;  %p740_p4 = pnand %p685_p9, %p948_p8 }
 0x312   : > { %s631_s17 = scalar_lea.sflag [#allocation4], %s630_s16 }
 0x313   : > { %843 = dma.done.wait (!%p740_p4), %s631_s17, 128  }
 0x314   : > { %845 = vsyncadd (!%p740_p4), %s631_s17, 4294967168  ;;  %p17_p5 = scmp.ge.s32.totalorder %s929_s30, 4   ;;  %s1078_s24 = smov %s852_s25 }
 0x315   : > { %s1079_s25 = smov %s856_s26  ;;  %s1080_s26 = smov %s942_s10 }
 0x316   : > { %s1081_s27 = smov %s929_s30  ;;  %19 = sbr.rel (!%p17_p5) target bundleno = 3 (0x3), region = 129 }
 0x31d   :  { %636 = vsyncpa [#allocation4], 1 }
 0x31e   :  { %638 = vsyncpa [#allocation4 + $0x1], 1 }

</bundles_post_ra>
